<compile_context>
chip_gen: v7x
topology: tpu7x:2x2x1
jax: 0.10.0
libtpu: 0.0.40
codegen_flags: <defaults>
</compile_context>

<pallas_src>
import functools

import jax
import jax.numpy as jnp
from jax import lax
from jax.experimental import pallas as pl
from jax.experimental.pallas import tpu as pltpu


_SUBLANE_Q = 16   # covers f32 (8,128) and bf16/f16 (16,128) native tiling


def _vmem_capacity_bytes():
    try:
        return int(pltpu.get_tpu_info().vmem_capacity_bytes)
    except Exception:
        return 128 * 1024 * 1024


def _pick_ts(R, C, itemsize, vmem_cap):
    """Sublane tile (rows of 128 px) for the logits block, VMEM-budgeted."""
    q = _SUBLANE_Q
    if R <= q:
        return R                                    # full-extent block, always legal
    per_buf = (2 if vmem_cap >= 96 * 1024 * 1024 else 1) * 1024 * 1024
    ts = per_buf // max(1, C * 128 * itemsize)
    ts = max(q, (ts // q) * q)
    ts = min(ts, 256)                               # ~32K px/step: past the roofline knee
    ts = min(ts, (R // q) * q)
    return ts


def _focal_factor(one_minus_pt, gamma):
    """(1 - pt) ** gamma, without relying on a pow lowering."""
    gi = int(round(gamma))
    if abs(gamma - gi) < 1e-12 and 0 < gi <= 8:
        r = one_minus_pt
        for _ in range(gi - 1):
            r = r * one_minus_pt
        return r
    # Fractional gamma: x**g = exp(g*log(x)) for x > 0, and 0 at x == 0.
    safe = jnp.maximum(one_minus_pt, jnp.float32(1e-30))
    powed = jnp.exp(jnp.float32(gamma) * jnp.log(safe))
    return jnp.where(one_minus_pt > 0.0, powed, jnp.float32(0.0))


def _focal_kernel(x_ref, t_ref, out_ref, *, gamma, alpha, n_classes, n_valid,
                  ts, lanes, j_inner, j_total, mask_tail):
    """One (image n, outer chunk jo, inner tile ji) step.

    x_ref  : (1, C, TS, 128)  logits tile (spatial on sublanes AND lanes)
    t_ref  : (1, 1, TS, 128)  int32 targets tile
    out_ref: (1, 1, TS, 128)  f32 partial-loss accumulator, resident across ji
    """
    jo = pl.program_id(1)
    ji = pl.program_id(2)

    @pl.when(ji == 0)
    def _():
        out_ref[...] = jnp.zeros_like(out_ref)

    x = x_ref[...].astype(jnp.float32)                # (1, C, TS, 128)
    t = t_ref[...]                                     # (1, 1, TS, 128)

    # Running max over classes: C-1 per-vreg maximums (no cross-sublane XLU).
    m = x[:, 0:1]
    for c in range(1, n_classes):
        m = jnp.maximum(m, x[:, c:c + 1])

    # Fused pass over classes: sum-exp + target gather + alpha gather.
    se = None
    zt = None
    at = jnp.full(t.shape, jnp.float32(alpha[0])) if alpha is not None else None
    for c in range(n_classes):
        zc = x[:, c:c + 1] - m
        ec = jnp.exp(zc)
        se = ec if se is None else se + ec
        sel = t == c
        zt = jnp.where(sel, zc, jnp.float32(0.0)) if zt is None else jnp.where(sel, zc, zt)
        if alpha is not None and c > 0:
            at = jnp.where(sel, jnp.float32(alpha[c]), at)

    logpt = zt - jnp.log(se)                           # log p_target (pre-alpha)

    if gamma == 0.0:
        focal = None
    else:
        pt = jnp.exp(logpt)                            # uses the UNSCALED logpt
        focal = _focal_factor(1.0 - pt, gamma)

    if alpha is not None:
        logpt = logpt * at

    loss = -logpt if focal is None else -(focal * logpt)   # (1, 1, TS, 128)

    if mask_tail:
        s_tile = jo * j_inner + ji
        is_last = s_tile == (j_total - 1)

        @pl.when(is_last)                              # only the last tile pays for masking
        def _():
            sub = lax.broadcasted_iota(jnp.int32, loss.shape, 2)
            lane = lax.broadcasted_iota(jnp.int32, loss.shape, 3)
            flat = (s_tile * ts + sub) * lanes + lane
            out_ref[...] += jnp.where(flat < n_valid, loss, jnp.float32(0.0))

        @pl.when(jnp.logical_not(is_last))
        def _():
            out_ref[...] += loss
    else:
        out_ref[...] += loss


def focal_loss(logits, target, *, gamma=0.0, alpha=None, size_average=True):
    """JAX/Pallas equivalent of FocalLoss.forward(logits, target)."""
    if logits.ndim > 2:
        N, C = int(logits.shape[0]), int(logits.shape[1])
        L = 1
        for d in logits.shape[2:]:
            L *= int(d)
        x3 = logits.reshape(N, C, L)                    # free row-major split
        t3 = target.reshape(N, 1, L)
    else:
        # TODO(synk): the 2-D classification path still pays one HBM transpose;
        # a native C-on-lanes kernel variant would remove it.
        M2, C = int(logits.shape[0]), int(logits.shape[1])
        x3 = jnp.transpose(logits, (1, 0)).reshape(1, C, M2)
        t3 = target.reshape(1, 1, M2)
        N, L = 1, M2

    t3 = t3.astype(jnp.int32)
    n_elems = N * L

    # alpha -> compile-time per-class constants (mirrors the module __init__).
    alpha_list = None
    if alpha is not None:
        if isinstance(alpha, (int, float)):
            alpha_list = [float(alpha), 1.0 - float(alpha)]
        elif isinstance(alpha, (list, tuple)):
            alpha_list = [float(a) for a in alpha]
        else:
            alpha_list = [float(a) for a in jnp.asarray(alpha).reshape(-1).tolist()]
        if len(alpha_list) < C:
            raise ValueError(f"alpha has {len(alpha_list)} entries but C={C}")
        alpha_list = tuple(alpha_list[:C])

    # Put the spatial axis onto (sublanes, 128 lanes).
    LANES = 128
    if L % LANES != 0:
        Lp = ((L + LANES - 1) // LANES) * LANES         # pad copy only when needed
        x3 = jnp.pad(x3, ((0, 0), (0, 0), (0, Lp - L)))
        t3 = jnp.pad(t3, ((0, 0), (0, 0), (0, Lp - L)))
    else:
        Lp = L
    R = Lp // LANES
    x4 = x3.reshape(N, C, R, LANES)
    t4 = t3.reshape(N, 1, R, LANES)

    vmem_cap = _vmem_capacity_bytes()
    ts = _pick_ts(R, C, jnp.dtype(x4.dtype).itemsize, vmem_cap)
    j_total = -(-R // ts)
    jo_n = 1
    for cand in (4, 2):                                 # v7x: parallelism independent of N
        if j_total % cand == 0:
            jo_n = cand
            break
    j_inner = j_total // jo_n
    mask_tail = (j_total * ts * LANES) != L

    kernel = functools.partial(
        _focal_kernel, gamma=float(gamma), alpha=alpha_list, n_classes=C,
        n_valid=L, ts=ts, lanes=LANES, j_inner=j_inner, j_total=j_total,
        mask_tail=mask_tail)

    vmem_limit = min(vmem_cap,
                     max(32 * 1024 * 1024, min(vmem_cap // 2, 64 * 1024 * 1024)))

    partials = pl.pallas_call(
        kernel,
        out_shape=jax.ShapeDtypeStruct((N, jo_n, ts, LANES), jnp.float32),
        grid_spec=pltpu.PrefetchScalarGridSpec(
            num_scalar_prefetch=0,
            grid=(N, jo_n, j_inner),
            in_specs=[
                pl.BlockSpec((1, C, ts, LANES),
                             lambda n, jo, ji: (n, 0, jo * j_inner + ji, 0)),
                pl.BlockSpec((1, 1, ts, LANES),
                             lambda n, jo, ji: (n, 0, jo * j_inner + ji, 0)),
            ],
            out_specs=pl.BlockSpec((1, 1, ts, LANES),
                                   lambda n, jo, ji: (n, jo, 0, 0)),
        ),
        compiler_params=pltpu.CompilerParams(
            dimension_semantics=("parallel", "parallel", "arbitrary"),
            vmem_limit_bytes=vmem_limit,
        ),
    )(x4, t4)

    total = jnp.sum(partials)                           # small tree-reduce in XLA
    if size_average:
        total = total / jnp.float32(n_elems)
    return total


def _focal_loss_ref(logits, target, *, gamma=0.0, alpha=None, size_average=True):
    """Pure-JAX reference mirroring the PyTorch forward."""
    if logits.ndim > 2:
        N, C = logits.shape[0], logits.shape[1]
        x = jnp.transpose(logits.reshape(N, C, -1), (0, 2, 1)).reshape(-1, C)
    else:
        x = logits
        C = x.shape[1]
    t = target.reshape(-1).astype(jnp.int32)
    logp = jax.nn.log_softmax(x.astype(jnp.float32), axis=1)
    logpt = jnp.take_along_axis(logp, t[:, None], axis=1)[:, 0]
    pt = jnp.exp(logpt)
    if alpha is not None:
        if isinstance(alpha, (float, int)):
            alpha = [alpha, 1.0 - alpha]
        at = jnp.asarray(alpha, jnp.float32)[t]
        logpt = logpt * at
    loss = -1.0 * (1.0 - pt) ** gamma * logpt
    return loss.mean() if size_average else loss.sum()


if __name__ == "__main__":
    key = jax.random.PRNGKey(0)
    k1, k2, k3, k4 = jax.random.split(key, 4)

    # Primary: NCHW segmentation-style inputs (gamma=2, per-class alpha, mean).
    N, C, H, W = 2, 4, 16, 16
    logits = jax.random.normal(k1, (N, C, H, W), dtype=jnp.float32)
    target = jax.random.randint(k2, (N, H, W), 0, C, dtype=jnp.int32)

    gamma = 2.0
    alpha = [0.1, 0.2, 0.3, 0.4]
    out = jax.block_until_ready(
        focal_loss(logits, target, gamma=gamma, alpha=alpha, size_average=True))
    ref = _focal_loss_ref(logits, target, gamma=gamma, alpha=alpha, size_average=True)
    assert jnp.allclose(out, ref, rtol=1e-4, atol=1e-5), (out, ref)

    # Sum reduction, no alpha, gamma=0 path.
    out2 = jax.block_until_ready(
        focal_loss(logits, target, gamma=0.0, alpha=None, size_average=False))
    ref2 = _focal_loss_ref(logits, target, gamma=0.0, alpha=None, size_average=False)
    assert jnp.allclose(out2, ref2, rtol=1e-4, atol=1e-4), (out2, ref2)

    # Ragged spatial size: exercises pad, tail-mask, multi-tile grid split and
    # the fractional-gamma path.
    N3, C3, H3, W3 = 1, 3, 72, 72
    lg3 = jax.random.normal(k3, (N3, C3, H3, W3), dtype=jnp.float32)
    tg3 = jax.random.randint(k4, (N3, H3, W3), 0, C3, dtype=jnp.int32)
    out3 = jax.block_until_ready(
        focal_loss(lg3, tg3, gamma=1.5, alpha=[0.2, 0.3, 0.5], size_average=True))
    ref3 = _focal_loss_ref(lg3, tg3, gamma=1.5, alpha=[0.2, 0.3, 0.5], size_average=True)
    assert jnp.allclose(out3, ref3, rtol=1e-4, atol=1e-4), (out3, ref3)

    # bf16 logits fed directly (cast happens in-VMEM).
    out4 = jax.block_until_ready(
        focal_loss(logits.astype(jnp.bfloat16), target, gamma=2.0, alpha=None,
                   size_average=True))
    ref4 = _focal_loss_ref(logits.astype(jnp.bfloat16), target, gamma=2.0, alpha=None,
                           size_average=True)
    assert jnp.allclose(out4, ref4, rtol=5e-3, atol=5e-3), (out4, ref4)

    print("KERNEL_OK")
</pallas_src>

<mosaic_0001>
module attributes {stable_mosaic.version = 11 : i64} {
  func.func @_focal_kernel(%arg0: i32, %arg1: i32, %arg2: i32, %arg3: memref<1x4x2x128xf32, #tpu.memory_space<vmem>>, %arg4: memref<1x1x2x128xi32, #tpu.memory_space<vmem>>, %arg5: memref<1x1x2x128xf32, #tpu.memory_space<vmem>>) attributes {dimension_semantics = [#tpu.dimension_semantics<parallel>, #tpu.dimension_semantics<parallel>, #tpu.dimension_semantics<arbitrary>], iteration_bounds = array<i64: 2, 1, 1>, scalar_prefetch = 0 : i64, scratch_operands = 0 : i64, tpu.core_type = #tpu.core_type<tc>, window_params = [{transform_indices = @transform_0, window_bounds = array<i64: 1, 4, 2, 128>}, {transform_indices = @transform_1, window_bounds = array<i64: 1, 1, 2, 128>}, {transform_indices = @transform_2, window_bounds = array<i64: 1, 1, 2, 128>}]} {
    %c0_i32 = arith.constant 0 : i32
    %0 = arith.cmpi eq, %arg2, %c0_i32 : i32
    %1 = arith.extui %0 : i1 to i32
    %c0_i32_0 = arith.constant 0 : i32
    %2 = arith.cmpi ne, %1, %c0_i32_0 : i32
    scf.if %2 {
      %cst_23 = arith.constant 0.000000e+00 : f32
      %60 = vector.broadcast %cst_23 : f32 to vector<1x1x2x128xf32>
      %c0_24 = arith.constant 0 : index
      %c0_25 = arith.constant 0 : index
      %c0_26 = arith.constant 0 : index
      %c0_27 = arith.constant 0 : index
      %61 = vector.load %arg5[%c0_24, %c0_25, %c0_26, %c0_27] : memref<1x1x2x128xf32, #tpu.memory_space<vmem>>, vector<1x1x2x128xf32>
      tpu.vector_store %arg5[%c0_24, %c0_25, %c0_26, %c0_27], %60 {strides = array<i32>} : memref<1x1x2x128xf32, #tpu.memory_space<vmem>>, vector<1x1x2x128xf32>,
    } else {
    }
    %c0 = arith.constant 0 : index
    %c0_1 = arith.constant 0 : index
    %c0_2 = arith.constant 0 : index
    %c0_3 = arith.constant 0 : index
    %3 = vector.load %arg3[%c0, %c0_1, %c0_2, %c0_3] : memref<1x4x2x128xf32, #tpu.memory_space<vmem>>, vector<1x4x2x128xf32>
    %c0_4 = arith.constant 0 : index
    %c0_5 = arith.constant 0 : index
    %c0_6 = arith.constant 0 : index
    %c0_7 = arith.constant 0 : index
    %4 = vector.load %arg4[%c0_4, %c0_5, %c0_6, %c0_7] : memref<1x1x2x128xi32, #tpu.memory_space<vmem>>, vector<1x1x2x128xi32>
    %5 = vector.extract_strided_slice %3 {offsets = [0, 0, 0, 0], sizes = [1, 1, 2, 128], strides = [1, 1, 1, 1]} : vector<1x4x2x128xf32> to vector<1x1x2x128xf32>
    %6 = vector.extract_strided_slice %3 {offsets = [0, 1, 0, 0], sizes = [1, 1, 2, 128], strides = [1, 1, 1, 1]} : vector<1x4x2x128xf32> to vector<1x1x2x128xf32>
    %7 = arith.maximumf %5, %6 : vector<1x1x2x128xf32>
    %8 = vector.extract_strided_slice %3 {offsets = [0, 2, 0, 0], sizes = [1, 1, 2, 128], strides = [1, 1, 1, 1]} : vector<1x4x2x128xf32> to vector<1x1x2x128xf32>
    %9 = arith.maximumf %7, %8 : vector<1x1x2x128xf32>
    %10 = vector.extract_strided_slice %3 {offsets = [0, 3, 0, 0], sizes = [1, 1, 2, 128], strides = [1, 1, 1, 1]} : vector<1x4x2x128xf32> to vector<1x1x2x128xf32>
    %11 = arith.maximumf %9, %10 : vector<1x1x2x128xf32>
    %cst = arith.constant 1.000000e-01 : f32
    %12 = vector.broadcast %cst : f32 to vector<1x1x2x128xf32>
    %13 = vector.extract_strided_slice %3 {offsets = [0, 0, 0, 0], sizes = [1, 1, 2, 128], strides = [1, 1, 1, 1]} : vector<1x4x2x128xf32> to vector<1x1x2x128xf32>
    %14 = arith.subf %13, %11 : vector<1x1x2x128xf32>
    %15 = math.exp %14 : vector<1x1x2x128xf32>
    %c0_i32_8 = arith.constant 0 : i32
    %16 = vector.broadcast %c0_i32_8 : i32 to vector<1x1x2x128xi32>
    %17 = arith.cmpi eq, %4, %16 : vector<1x1x2x128xi32>
    %cst_9 = arith.constant 0.000000e+00 : f32
    %18 = vector.broadcast %cst_9 : f32 to vector<1x1x2x128xf32>
    %19 = arith.select %17, %14, %18 : vector<1x1x2x128xi1>, vector<1x1x2x128xf32>
    %20 = vector.extract_strided_slice %3 {offsets = [0, 1, 0, 0], sizes = [1, 1, 2, 128], strides = [1, 1, 1, 1]} : vector<1x4x2x128xf32> to vector<1x1x2x128xf32>
    %21 = arith.subf %20, %11 : vector<1x1x2x128xf32>
    %22 = math.exp %21 : vector<1x1x2x128xf32>
    %23 = arith.addf %15, %22 : vector<1x1x2x128xf32>
    %c1_i32 = arith.constant 1 : i32
    %24 = vector.broadcast %c1_i32 : i32 to vector<1x1x2x128xi32>
    %25 = arith.cmpi eq, %4, %24 : vector<1x1x2x128xi32>
    %26 = arith.select %25, %21, %19 : vector<1x1x2x128xi1>, vector<1x1x2x128xf32>
    %cst_10 = arith.constant 2.000000e-01 : f32
    %27 = vector.broadcast %cst_10 : f32 to vector<1x1x2x128xf32>
    %28 = arith.select %25, %27, %12 : vector<1x1x2x128xi1>, vector<1x1x2x128xf32>
    %29 = vector.extract_strided_slice %3 {offsets = [0, 2, 0, 0], sizes = [1, 1, 2, 128], strides = [1, 1, 1, 1]} : vector<1x4x2x128xf32> to vector<1x1x2x128xf32>
    %30 = arith.subf %29, %11 : vector<1x1x2x128xf32>
    %31 = math.exp %30 : vector<1x1x2x128xf32>
    %32 = arith.addf %23, %31 : vector<1x1x2x128xf32>
    %c2_i32 = arith.constant 2 : i32
    %33 = vector.broadcast %c2_i32 : i32 to vector<1x1x2x128xi32>
    %34 = arith.cmpi eq, %4, %33 : vector<1x1x2x128xi32>
    %35 = arith.select %34, %30, %26 : vector<1x1x2x128xi1>, vector<1x1x2x128xf32>
    %cst_11 = arith.constant 3.000000e-01 : f32
    %36 = vector.broadcast %cst_11 : f32 to vector<1x1x2x128xf32>
    %37 = arith.select %34, %36, %28 : vector<1x1x2x128xi1>, vector<1x1x2x128xf32>
    %38 = vector.extract_strided_slice %3 {offsets = [0, 3, 0, 0], sizes = [1, 1, 2, 128], strides = [1, 1, 1, 1]} : vector<1x4x2x128xf32> to vector<1x1x2x128xf32>
    %39 = arith.subf %38, %11 : vector<1x1x2x128xf32>
    %40 = math.exp %39 : vector<1x1x2x128xf32>
    %41 = arith.addf %32, %40 : vector<1x1x2x128xf32>
    %c3_i32 = arith.constant 3 : i32
    %42 = vector.broadcast %c3_i32 : i32 to vector<1x1x2x128xi32>
    %43 = arith.cmpi eq, %4, %42 : vector<1x1x2x128xi32>
    %44 = arith.select %43, %39, %35 : vector<1x1x2x128xi1>, vector<1x1x2x128xf32>
    %cst_12 = arith.constant 4.000000e-01 : f32
    %45 = vector.broadcast %cst_12 : f32 to vector<1x1x2x128xf32>
    %46 = arith.select %43, %45, %37 : vector<1x1x2x128xi1>, vector<1x1x2x128xf32>
    %47 = math.log %41 : vector<1x1x2x128xf32>
    %48 = arith.subf %44, %47 : vector<1x1x2x128xf32>
    %49 = math.exp %48 : vector<1x1x2x128xf32>
    %cst_13 = arith.constant 1.000000e+00 : f32
    %50 = vector.broadcast %cst_13 : f32 to vector<1x1x2x128xf32>
    %51 = arith.subf %50, %49 : vector<1x1x2x128xf32>
    %52 = arith.mulf %51, %51 : vector<1x1x2x128xf32>
    %53 = arith.mulf %48, %46 : vector<1x1x2x128xf32>
    %54 = arith.mulf %52, %53 : vector<1x1x2x128xf32>
    %cst_14 = arith.constant 0.000000e+00 : f32
    %55 = vector.broadcast %cst_14 : f32 to vector<1x1x2x128xf32>
    %56 = arith.subf %55, %54 : vector<1x1x2x128xf32>
    %c0_15 = arith.constant 0 : index
    %c0_16 = arith.constant 0 : index
    %c0_17 = arith.constant 0 : index
    %c0_18 = arith.constant 0 : index
    %57 = vector.load %arg5[%c0_15, %c0_16, %c0_17, %c0_18] : memref<1x1x2x128xf32, #tpu.memory_space<vmem>>, vector<1x1x2x128xf32>
    %58 = arith.addf %57, %56 : vector<1x1x2x128xf32>
    %c0_19 = arith.constant 0 : index
    %c0_20 = arith.constant 0 : index
    %c0_21 = arith.constant 0 : index
    %c0_22 = arith.constant 0 : index
    %59 = vector.load %arg5[%c0_19, %c0_20, %c0_21, %c0_22] : memref<1x1x2x128xf32, #tpu.memory_space<vmem>>, vector<1x1x2x128xf32>
    tpu.vector_store %arg5[%c0_19, %c0_20, %c0_21, %c0_22], %58 {strides = array<i32>} : memref<1x1x2x128xf32, #tpu.memory_space<vmem>>, vector<1x1x2x128xf32>,
    return
  }
  func.func @transform_0(%arg0: i32, %arg1: i32, %arg2: i32) -> (i32, i32, i32, i32) {
    %c1_i32 = arith.constant 1 : i32
    %0 = arith.muli %arg1, %c1_i32 : i32
    %1 = arith.addi %0, %arg2 : i32
    %c0_i32 = arith.constant 0 : i32
    %c0_i32_0 = arith.constant 0 : i32
    %c0_i32_1 = arith.constant 0 : i32
    return %arg0, %c0_i32, %1, %c0_i32_0 : i32, i32, i32, i32
  }
  func.func @transform_1(%arg0: i32, %arg1: i32, %arg2: i32) -> (i32, i32, i32, i32) {
    %c1_i32 = arith.constant 1 : i32
    %0 = arith.muli %arg1, %c1_i32 : i32
    %1 = arith.addi %0, %arg2 : i32
    %c0_i32 = arith.constant 0 : i32
    %c0_i32_0 = arith.constant 0 : i32
    %c0_i32_1 = arith.constant 0 : i32
    return %arg0, %c0_i32, %1, %c0_i32_0 : i32, i32, i32, i32
  }
  func.func @transform_2(%arg0: i32, %arg1: i32, %arg2: i32) -> (i32, i32, i32, i32) {
    %c0_i32 = arith.constant 0 : i32
    %c0_i32_0 = arith.constant 0 : i32
    %c0_i32_1 = arith.constant 0 : i32
    return %arg0, %arg1, %c0_i32, %c0_i32_0 : i32, i32, i32, i32
  }
}

</mosaic_0001>

<bundles_post_ra>
// kernel: tpu_custom_call.1
= control target key start
LH: loop header
LB: loop body
LE: loop exit
PB: predicated region body
PF: predicated region fallthrough
CT: control target
= control target key end

     0   :  { %7 = vsyncpa [#allocation3], 0  ;;  %s903_s0 = inlined_call_operand.hbm [shape: f32[2,4,2,128], index: 0, kind: input, shape index: {}]   ;;  %s904_s1 = inlined_call_operand.hbm [shape: s32[2,1,2,128], index: 1, kind: input, shape index: {}]   ;;  %s905_s2 = inlined_call_operand.hbm [shape: f32[2,1,2,128], index: 2, kind: output, shape index: {}]  }
   0x1   :  { %9 = vsyncpa [#allocation3 + $0x1], 0 }
   0x2   :  { %10 = vsyncpa [#allocation6], 0 }
   0x3   :  { %12 = vsyncpa [#allocation6 + $0x1], 0 }
   0x4   :  { %13 = vsyncpa [#allocation4], 0 }
   0x5   :  { %15 = vsyncpa [#allocation4 + $0x1], 0  ;;  %s682_s9 = smov 0   ;;  %s684_s10 = smov 0  }
   0x6   :  { %s686_s11 = smov 0   ;;  %s688_s12 = smov 0  }
   0x7   :  { %s690_s13 = smov 0   ;;  %s692_s14 = smov 0  }
   0x8 LB: > { %s411_s15 = sadd.s32 4294967295, %s658_s14   ;;  %s412_s16 = sadd.s32 4294967294, %s658_s14   ;;  %s658_s14 = sphi %s692_s14, %s21_s14   ;;  %s654_s13 = sphi %s690_s13, %s924_s13   ;;  %s650_s12 = sphi %s688_s12, %s923_s12   ;;  %s646_s11 = sphi %s686_s11, %s922_s11   ;;  %s642_s10 = sphi %s684_s10, %s921_s10   ;;  %s638_s9 = sphi %s682_s9, %s920_s9  }
   0x9   : > { %s40_s17 = sadd.s32 1, %s654_s13  ;;  %s51_s18 = sadd.s32 1, %s646_s11 }
   0xa   : > { %p42_p0 = scmp.ge.s32.totalorder %s40_s17, 2  ;;  %p58_p1 = scmp.ne.s32.totalorder %s646_s11, %s642_s10 }
   0xb   : > { %p59_p2 = scmp.eq.s32.totalorder %s658_s14, 0  ;;  %p64_p3 = scmp.ne.s32.totalorder %s642_s10, %s638_s9 }
   0xc   : > { %s926_s17 = smov (%p42_p0, %s40_s17), 0  ;;  %p65_p5 = scmp.eq.s32.totalorder %s411_s15, 0 }
   0xd   : > { %p723_p4 = por %p59_p2, %p58_p1  ;;  %s46_s20 = ssub.s32 %s654_s13, %s926_s17 }
   0xe   : > { %p120_p6 = scmp.eq.s32.totalorder %s411_s15, 1  ;;  %p49_p7 = scmp.eq.s32.totalorder %s46_s20, 0 }
   0xf   : > { %p729_p8 = por %p65_p5, %p64_p3  ;;  %p126_p10 = scmp.eq.s32.totalorder %s412_s16, 1 }
  0x10   : > { %p733_p9 = por %p120_p6, %p58_p1  ;;  %p446_p13 = scmp.lt.s32.totalorder %s658_s14, 2 }
  0x11   : > { %s909_s21 = scalar_select %p729_p8, 1, 0 }
  0x12   : > { %s910_s22 = scalar_select %p733_p9, 1, 0 }
  0x13   : > { %s738_s23 = scalar_select %p49_p7, %s646_s11, %s51_s18  }
  0x14   : > { %p740_p11 = por %p126_p10, %p64_p3  ;;  %s747_s25 = sand.u32 1, %s646_s11  }
  0x15   : > { %s415_s26 = sshll.u32 %s747_s25, 3  ;;  %s428_s27 = sshll.u32 %s654_s13, 7 }
  0x16   : > { %s911_s24 = scalar_select %p740_p11, 1, 0 }
  0x17   : > { %s754_s30 = scalar_lea.hbm %s903_s0, %s428_s27  ;;  %s150_s3 = scalar_lea.vmem [#allocation2], %s415_s26 }
  0x18   : > { %s159_s4 = sshll.u32 %s150_s3, 4  ;;  %p760_p0 = pnand %p446_p13, %p723_p4  ;;  %s756_s4 = int_to_ptr.vmem [resolvable:$true] %s159_s4 }
  0x19   : > { %s147_s6 = scalar_lea.sflag [#allocation3], %s747_s25  ;;  %s512_s7 = scalar_lea.hbm %s754_s30, 128 }
  0x1a   : > { %p513_p2 = scmp.ne.s32.totalorder %s754_s30, %s512_s7  ;;  %p514_p3 = pneg %p760_p0 }
  0x1b   : > { %s517_s16 = scalar_lea.hbm %s903_s0, 256  ;;  %p518_p4 = scmp.lt.u32.totalorder %s754_s30, %s903_s0 }
  0x1c   : > { %p515_p5 = pnand %p514_p3, %p513_p2  ;;  %p519_p7 = scmp.lt.u32.totalorder %s517_s16, %s512_s7 }
  0x1d   : > { %p521_p13 = scmp.lt.u32.totalorder %s512_s7, %s754_s30 }
  0x1e   : > { %p516_p6 = pneg %p515_p5  ;;  %p520_p10 = por %p519_p7, %p518_p4 }
  0x20   : > { %p522_p12 = por %p521_p13, %p520_p10 }
  0x22   : > { %p523_p1 = pnand %p522_p12, %p516_p6 }
  0x24   : > { %526 = shalt.err (!%p523_p1)
}
  0x25   : > { %s527_s20 = scalar_lea.vmem %s756_s4, 128  ;;  %s660_s26 = smov [#allocation2]  }
  0x26   : > { %p528_p2 = scmp.ne.s32.totalorder %s756_s4, %s527_s20  ;;  %s532_s27 = sshll.u32 %s660_s26, 4  ;;  %s533_s27 = int_to_ptr.vmem [resolvable:$false] %s532_s27 }
  0x27   : > { %s534_s28 = scalar_lea.vmem %s533_s27, 256  ;;  %p535_p9 = scmp.lt.s32.totalorder %s756_s4, %s533_s27 }
  0x28   : > { %p530_p5 = pnand %p528_p2, %p514_p3  ;;  %p536_p4 = scmp.lt.s32.totalorder %s534_s28, %s527_s20 }
  0x2a   : > { %p531_p11 = pneg %p530_p5  ;;  %p537_p7 = por %p536_p4, %p535_p9 }
  0x2c   : > { %p538_p10 = pnand %p537_p7, %p531_p11 }
  0x2e   : > { %541 = shalt.err (!%p538_p10)
}
  0x2f   : > { %s661_s29 = smov 32   ;;  %s662_s3 = smov 2  }
  0x30   : > { %438 = dma.hbm_to_vmem [thread:$0]  (!%p760_p0), %s754_s30, 128, %s756_s4, %s147_s6, %s661_s29, %s661_s29, %s662_s3  }
  0x31   : > { %p187_p12 = scmp.lt.s32.totalorder %s658_s14, 3  ;;  %s418_s7 = sshll.u32 %s747_s25, 1 }
  0x32   : > { %s419_s8 = sshll.u32 %s654_s13, 5  ;;  %p913_p9 = scmp.ge.s32.totalorder %s658_s14, 1 }
  0x33   : > { %s805_s19 = scalar_lea.hbm %s904_s1, %s419_s8  ;;  %s173_s20 = scalar_lea.vmem [#allocation5], %s418_s7 }
  0x34   : > { %p798_p11 = pnand %p913_p9, %p187_p12  ;;  %s182_s26 = sshll.u32 %s173_s20, 4  ;;  %s183_s26 = int_to_ptr.vmem [resolvable:$true] %s182_s26 }
  0x35   : > { %s170_s30 = scalar_lea.sflag [#allocation6], %s747_s25  ;;  %s542_s4 = scalar_lea.hbm %s805_s19, 32 }
  0x36   : > { %s914_s15 = scalar_select %p798_p11, 1, 0 }
  0x37   : > { %p543_p1 = scmp.ne.s32.totalorder %s805_s19, %s542_s4  ;;  %s547_s28 = scalar_lea.hbm %s904_s1, 64 }
  0x38   : > { %p548_p2 = scmp.lt.u32.totalorder %s805_s19, %s904_s1  ;;  %p549_p5 = scmp.lt.u32.totalorder %s547_s28, %s542_s4 }
  0x39   : > { %p545_p6 = pnand %p543_p1, %p514_p3  ;;  %p551_p7 = scmp.lt.u32.totalorder %s542_s4, %s805_s19 }
  0x3a   : > { %p550_p4 = por %p549_p5, %p548_p2 }
  0x3b   : > { %p546_p13 = pneg %p545_p6 }
  0x3c   : > { %p552_p10 = por %p551_p7, %p550_p4 }
  0x3e   : > { %p553_p12 = pnand %p552_p10, %p546_p13 }
  0x40   : > { %556 = shalt.err (!%p553_p12)
}
  0x41   : > { %s557_s25 = scalar_lea.vmem %s183_s26, 32  ;;  %s663_s7 = smov [#allocation5]  }
  0x42   : > { %p558_p9 = scmp.ne.s32.totalorder %s183_s26, %s557_s25  ;;  %s562_s8 = sshll.u32 %s663_s7, 4  ;;  %s563_s8 = int_to_ptr.vmem [resolvable:$false] %s562_s8 }
  0x43   : > { %s564_s16 = scalar_lea.vmem %s563_s8, 64  ;;  %p565_p8 = scmp.lt.s32.totalorder %s183_s26, %s563_s8 }
  0x44   : > { %p560_p1 = pnand %p558_p9, %p514_p3  ;;  %p566_p11 = scmp.lt.s32.totalorder %s564_s16, %s557_s25 }
  0x46   : > { %p561_p6 = pneg %p560_p1  ;;  %p567_p2 = por %p566_p11, %p565_p8 }
  0x48   : > { %p568_p5 = pnand %p567_p2, %p561_p6 }
  0x4a   : > { %571 = shalt.err (!%p568_p5)
}
  0x4b   : > { %441 = dma.hbm_to_vmem [thread:$0]  (!%p760_p0), %s805_s19, 32, %s183_s26, %s170_s30  }
  0x4c   : > { %p915_p13 = scmp.ne.s32.totalorder %s914_s15, 0 }
  0x4d   : > { %s830_s18 = sand.u32 (!%p915_p13), 1, %s642_s10   ;;  %p916_p3 = scmp.ne.s32.totalorder (!%p915_p13), %s909_s21, 0 }
  0x4e   : > { %191 = sbr.rel (%p915_p13) target bundleno = 171 (0xab), region = 28  ;;  %s421_s20 = sshll.u32 (!%p915_p13), %s830_s18, 3 }
  0x4f   : > { %s194_s4 = scalar_lea.sflag (!%p915_p13), [#allocation3], %s830_s18  ;;  %s197_s6 = scalar_lea.vmem (!%p915_p13), [#allocation2], %s421_s20 }
  0x55   : > { %625 = dma.done.wait (%p916_p3), %s194_s4, 128  }
  0x56   : > { %627 = vsyncadd (%p916_p3), %s194_s4, 4294967168  ;;  %s422_s5 = sshll.u32 %s830_s18, 1  ;;  %s203_s15 = scalar_lea.sflag [#allocation6], %s830_s18 }
  0x57   : > { %s206_s19 = scalar_lea.vmem [#allocation5], %s422_s5 }
  0x58   : > { %629 = dma.done.wait (%p916_p3), %s203_s15, 32  }
  0x59   : > { %631 = vsyncadd (%p916_p3), %s203_s15, 4294967264  ;;  %s844_s26 = scalar_lea.vmem [#allocation7], %s422_s5  ;;  %v664_v0 = vmov 0.0   ;;  %v239_v1 = vld [vmem:[%s197_s6] sm:$0x3]  ;;  %s425_s21 = sshll.u32 %s650_s12, 5 }
  0x5a   : > { %238 = vst [vmem:[%s844_s26] sm:$0x3] %v664_v0  ;;  %v240_v2 = vld [vmem:[%s197_s6 + $0x2] sm:$0x3]  ;;  %v241_v3 = vld [vmem:[%s197_s6 + $0x4] sm:$0x3]  ;;  %s301_s30 = sshll.u32 %s844_s26, 4  ;;  %s853_s29 = scalar_lea.hbm %s905_s2, %s425_s21  ;;  %s855_s30 = int_to_ptr.vmem [resolvable:$true] %s301_s30 }
  0x5b   : > { %v244_v4 = vmax.f32 %v239_v1, %v240_v2  ;;  %v242_v5 = vld [vmem:[%s197_s6 + $0x6] sm:$0x3]  ;;  %v243_v21 = vld [vmem:[%s206_s19] sm:$0x3]  ;;  %v665_v32 = vmov 0.1  }
  0x5c   : > { %vm250_vm0 = vcmp.eq.s32.totalorder %v243_v21, 0  ;;  %vm256_vm1 = vcmp.eq.s32.totalorder %v243_v21, 1  ;;  %vm263_vm2 = vcmp.eq.s32.totalorder %v243_v21, 2  ;;  %vm270_vm3 = vcmp.eq.s32.totalorder %v243_v21, 3  ;;  %s287_s3 = scalar_lea.sflag [#allocation4], %s830_s18  ;;  %s572_s25 = scalar_lea.vmem %s855_s30, 32 }
  0x5d   : > { %v245_v6 = vmax.f32 %v244_v4, %v241_v3  ;;  %v258_v33 = vsel %vm256_vm1, 0.2, %v665_v32  ;;  %p573_p8 = scmp.ne.s32.totalorder %s855_s30, %s572_s25  ;;  %p917_p0 = scmp.ne.s32.totalorder %s910_s22, 0 }
  0x5e   : > { %v265_v34 = vsel %vm263_vm2, 0.3, %v258_v33  ;;  %s666_s12 = smov [#allocation7]  }
  0x5f   : > { %v246_v7 = vmax.f32 %v245_v6, %v242_v5  ;;  %v272_v35 = vsel %vm270_vm3, 0.4, %v265_v34  ;;  %p574_p11 = pnand %p573_p8, %p917_p0  ;;  %s576_s7 = sshll.u32 %s666_s12, 4  ;;  %s577_s7 = int_to_ptr.vmem [resolvable:$false] %s576_s7 }
  0x60   : > { %s578_s8 = scalar_lea.vmem %s577_s7, 64  ;;  %p579_p7 = scmp.lt.s32.totalorder %s855_s30, %s577_s7 }
  0x61   : > { %v247_v8 = vsub.f32 %v239_v1, %v246_v7  ;;  %v252_v9 = vsub.f32 %v240_v2, %v246_v7  ;;  %v259_v10 = vsub.f32 %v241_v3, %v246_v7  ;;  %v266_v11 = vsub.f32 %v242_v5, %v246_v7  ;;  %v283_v41 = vld [vmem:[%s844_s26] sm:$0x3]  ;;  %p575_p4 = pneg %p574_p11  ;;  %p580_p10 = scmp.lt.s32.totalorder %s578_s8, %s572_s25 }
  0x63   : > { %v248_v12 = vmul.f32 1.442695, %v247_v8  ;;  %v253_v13 = vmul.f32 1.442695, %v252_v9  ;;  %v260_v14 = vmul.f32 1.442695, %v259_v10  ;;  %p581_p12 = por %p580_p10, %p579_p7 }
  0x64   : > { %v267_v15 = vmul.f32 1.442695, %v266_v11  ;;  %v251_v24 = vsel %vm250_vm0, %v247_v8, 0.0 }
  0x65   : > { %500 = vpow2.f32 %v248_v12  ;;  %v257_v25 = vsel %vm256_vm1, %v252_v9, %v251_v24  ;;  %p582_p9 = pnand %p581_p12, %p575_p4 }
  0x66   : > { %502 = vpow2.f32 %v253_v13  ;;  %v264_v26 = vsel %vm263_vm2, %v259_v10, %v257_v25 }
  0x67   : > { %504 = vpow2.f32 %v260_v14  ;;  %v271_v28 = vsel %vm270_vm3, %v266_v11, %v264_v26 }
  0x68   : > { %506 = vpow2.f32 %v267_v15 }
  0x6f   : > { %v501_v16 = vpop.eup %500 }
  0x70   : > { %v503_v17 = vpop.eup %502 }
  0x71   : > { %v505_v18 = vpop.eup %504  ;;  %v255_v19 = vadd.f32 %v503_v17, %v501_v16 }
  0x72   : > { %v507_v20 = vpop.eup %506 }
  0x73   : > { %v262_v22 = vadd.f32 %v505_v18, %v255_v19 }
  0x75   : > { %v269_v23 = vadd.f32 %v507_v20, %v262_v22 }
  0x77   : > { %508 = vlog2.f32 %v269_v23 }
  0x81   : > { %v509_v27 = vpop.eup %508 }
  0x82   : > { %v274_v29 = vmul.f32 0.6931472, %v509_v27 }
  0x84   : > { %v275_v30 = vsub.f32 %v271_v28, %v274_v29 }
  0x86   : > { %v276_v31 = vmul.f32 1.442695, %v275_v30  ;;  %v280_v38 = vmul.f32 %v275_v30, %v272_v35 }
  0x88   : > { %510 = vpow2.f32 %v276_v31 }
  0x92   : > { %v511_v36 = vpop.eup %510 }
  0x93   : > { %v278_v37 = vsub.f32 1.0, %v511_v36 }
  0x95   : > { %v279_v39 = vmul.f32 %v278_v37, %v278_v37 }
  0x97   : > { %v281_v40 = vmul.f32 %v280_v38, %v279_v39 }
  0x99   : > { %v282_v42 = vsub.f32 0.0, %v281_v40 }
  0x9b   : > { %v284_v43 = vadd.f32 %v283_v41, %v282_v42 }
  0x9d   : > { %285 = vst [vmem:[%s844_s26] sm:$0x3] %v284_v43 }
  0x9e   : > { %585 = shalt.err (!%p582_p9)
}
  0x9f   : > { %s586_s16 = scalar_lea.hbm %s853_s29, 32  ;;  %s590_s4 = scalar_lea.hbm %s905_s2, 64 }
  0xa0   : > { %p587_p1 = scmp.ne.s32.totalorder %s853_s29, %s586_s16  ;;  %p591_p5 = scmp.lt.u32.totalorder %s853_s29, %s905_s2 }
  0xa1   : > { %p592_p13 = scmp.lt.u32.totalorder %s590_s4, %s586_s16  ;;  %p594_p8 = scmp.lt.u32.totalorder %s586_s16, %s853_s29 }
  0xa2   : > { %p588_p6 = pnand %p587_p1, %p917_p0 }
  0xa3   : > { %p593_p3 = por %p592_p13, %p591_p5 }
  0xa4   : > { %p589_p2 = pneg %p588_p6 }
  0xa5   : > { %p595_p11 = por %p594_p8, %p593_p3 }
  0xa7   : > { %p596_p4 = pnand %p595_p11, %p589_p2 }
  0xa9   : > { %599 = shalt.err (!%p596_p4)
}
  0xaa   : > { %433 = dma.vmem_to_hbm [thread:$0]  (%p917_p0), %s855_s30, 32, %s853_s29, %s287_s3  }
  0xab PF: > { %s313_s15 = sand.u32 1, %s638_s9   ;;  %p918_p7 = scmp.ne.s32.totalorder %s911_s24, 0 }
  0xac   : > { %p919_p10 = scmp.ge.s32.totalorder %s658_s14, 2  ;;  %s314_s19 = scalar_lea.sflag [#allocation4], %s313_s15 }
  0xae   : > { %p443_p12 = pnand %p919_p10, %p918_p7 }
  0xb0   : > { %633 = dma.done.wait (!%p443_p12), %s314_s19, 32  }
  0xb1   : > { %635 = vsyncadd (!%p443_p12), %s314_s19, 4294967264  ;;  %s21_s14 = sadd.s32 1, %s658_s14   ;;  %s920_s9 = smov %s642_s10 }
  0xb2   : > { %p18_p9 = scmp.ge.s32.totalorder %s21_s14, 4   ;;  %s921_s10 = smov %s646_s11 }
  0xb3   : > { %s922_s11 = smov %s738_s23  ;;  %s923_s12 = smov %s654_s13 }
  0xb4   : > { %s924_s13 = smov %s926_s17  ;;  %20 = sbr.rel (!%p18_p9) target bundleno = 8 (0x8), region = 90 }
  0xbb   :  { %319 = vsyncpa [#allocation3], 1 }
  0xbc   :  { %321 = vsyncpa [#allocation3 + $0x1], 1 }
  0xbd   :  { %322 = vsyncpa [#allocation6], 1 }
  0xbe   :  { %324 = vsyncpa [#allocation6 + $0x1], 1 }
  0xbf   :  { %325 = vsyncpa [#allocation4], 1 }
  0xc0   :  { %327 = vsyncpa [#allocation4 + $0x1], 1 }

</bundles_post_ra>
